<compile_context>
chip_gen: v7x
topology: tpu7x:2x2x1
jax: 0.10.0
libtpu: 0.0.40
codegen_flags: <defaults>
</compile_context>

<pallas_src>
import functools

import jax
import jax.numpy as jnp
from jax import lax
from jax.experimental import pallas as pl
from jax.experimental.pallas import tpu as pltpu


def _adain_relu_kernel(x_ref, gamma_ref, beta_ref, o_ref, *, eps):
    """relu(gamma * InstanceNorm(x) + beta) for a block of (batch*channel) rows.

    x_ref     : (R_blk, HW)  rows = (b, c) pairs, spatial flattened onto the lane axis
    gamma_ref : (R_blk, 1)   per-row scale  (precomputed in the wrapper)
    beta_ref  : (R_blk, 1)   per-row shift  (precomputed in the wrapper)
    o_ref     : (R_blk, HW)
    """
    x = x_ref[...].astype(jnp.float32)
    gamma = gamma_ref[...].astype(jnp.float32)
    beta = beta_ref[...].astype(jnp.float32)

    # InstanceNorm2d (no affine): per-(sample, channel) stats over spatial positions.
    # Biased, two-pass variance — matches InstanceNorm2d; do not "optimize" into E[x^2]-E[x]^2.
    mu = jnp.mean(x, axis=-1, keepdims=True)                       # (R_blk, 1)
    var = jnp.mean(jnp.square(x - mu), axis=-1, keepdims=True)     # (R_blk, 1)
    x_hat = (x - mu) * lax.rsqrt(var + eps)

    # AdaIN affine + final ReLU (single VALU max).
    o_ref[...] = jnp.maximum(gamma * x_hat + beta, 0.0).astype(o_ref.dtype)


def _choose_row_block(total_rows, hw, itemsize, target_bytes):
    """Largest row-block that divides total_rows, is a multiple of 8 (sublane), fits the
    byte target, and (when possible) leaves >= 2 grid steps for megacore sharding."""
    max_rows = max(8, target_bytes // max(1, hw * itemsize))
    divisors_of_8 = [r for r in range(8, total_rows + 1, 8) if total_rows % r == 0]
    good = sorted(r for r in divisors_of_8 if r <= max_rows)
    if not good:
        # No (8,128)-compliant tiling fits; fall back to the full extent (always legal).
        return total_rows
    r = good[-1]
    if r == total_rows and len(good) > 1:
        r = good[-2]   # prefer >= 2 grid steps so both v7x TensorCores get work
    return r


def conv_block_forward(x, style, ada_w, ada_b, *, eps=1e-5, target_block_bytes=2 << 20):
    """ConvBlock.forward(input, style) == relu(AdaIN(input, style)) per the module as written.

    x     : (B, C, H, W) float32
    style : (B, S) float32, S == C for ConvBlock(n_channels)
    ada_w : (2C, S) float32  -- AdaIn's nn.Linear weight, PyTorch (out, in) layout
    ada_b : (2C,)   float32  -- AdaIn's nn.Linear bias
    (conv1/conv2 parameters are intentionally not taken: their outputs are discarded.)
    """
    B, C, H, W = x.shape
    S = style.shape[1]
    assert style.shape == (B, S)
    assert ada_w.shape == (2 * C, S)
    assert ada_b.shape == (2 * C,)

    HW = H * W
    R = B * C

    # --- tiny pre-pass (XLA matmul): [gamma | beta] = style @ W.T + b, one row per (b, c) ---
    gb = style.astype(jnp.float32) @ ada_w.astype(jnp.float32).T + ada_b.astype(jnp.float32)
    gamma = gb[:, :C].reshape(R, 1)
    beta = gb[:, C:].reshape(R, 1)

    # --- flatten activations to lane-dense rows and pick a MiB-scale row block ---
    x2 = x.reshape(R, HW)
    r_blk = _choose_row_block(R, HW, x2.dtype.itemsize, target_block_bytes)
    grid = (R // r_blk,)

    # Raise scoped VMEM only if the double-buffered in+out blocks exceed the smallest
    # (v5e, 16 MiB) default; cap with headroom below v7x's 64 MiB physical VMEM.
    block_bytes = r_blk * HW * x2.dtype.itemsize
    vmem_needed = 2 * 2 * block_bytes + 2 * 2 * r_blk * 8   # in/out double-buffered + gamma/beta
    vmem_limit = None
    if vmem_needed > (16 << 20):
        vmem_limit = min(int(vmem_needed * 3 // 2), 48 << 20)

    cost = pl.CostEstimate(
        flops=8 * R * HW,                       # sub/mul/add/max per element (negligible)
        transcendentals=R,                      # one rsqrt per row
        bytes_accessed=2 * R * HW * x2.dtype.itemsize + 2 * R * 4,
    )

    kernel = functools.partial(_adain_relu_kernel, eps=eps)

    out2 = pl.pallas_call(
        kernel,
        out_shape=jax.ShapeDtypeStruct((R, HW), x.dtype),
        grid_spec=pltpu.PrefetchScalarGridSpec(
            num_scalar_prefetch=0,
            grid=grid,
            in_specs=[
                pl.BlockSpec((r_blk, HW), lambda i: (i, 0)),   # activations
                pl.BlockSpec((r_blk, 1), lambda i: (i, 0)),    # gamma rows
                pl.BlockSpec((r_blk, 1), lambda i: (i, 0)),    # beta rows
            ],
            out_specs=pl.BlockSpec((r_blk, HW), lambda i: (i, 0)),
        ),
        compiler_params=pltpu.CompilerParams(
            dimension_semantics=("parallel",),   # independent row blocks -> megacore on v7x
            vmem_limit_bytes=vmem_limit,
        ),
        cost_estimate=cost,
    )(x2, gamma, beta)

    return out2.reshape(B, C, H, W)


def conv_block_reference(x, style, ada_w, ada_b, *, eps=1e-5):
    """Pure-JAX reference mirroring the PyTorch forward as written (convs are dead code)."""
    B, C, H, W = x.shape
    gb = style @ ada_w.T + ada_b                       # (B, 2C)
    gamma = gb[:, :C][:, :, None, None]
    beta = gb[:, C:][:, :, None, None]
    mu = jnp.mean(x, axis=(2, 3), keepdims=True)
    var = jnp.mean(jnp.square(x - mu), axis=(2, 3), keepdims=True)
    x_hat = (x - mu) * lax.rsqrt(var + eps)
    return jnp.maximum(gamma * x_hat + beta, 0.0)


if __name__ == "__main__":
    # Small TPU-friendly shapes: batch=2, channels=8, 16x16 spatial (HW=256 lane-dense,
    # B*C=16 rows -> two (8, 256) row blocks -> 2 parallel grid steps).
    B, C, H, W = 2, 8, 16, 16
    S = C   # ConvBlock builds AdaIn(n_channels, n_channels) -> style_dim == n_channels

    key = jax.random.PRNGKey(0)
    kx, ks, kw, kb = jax.random.split(key, 4)

    x = jax.random.normal(kx, (B, C, H, W), dtype=jnp.float32)
    style = jax.random.normal(ks, (B, S), dtype=jnp.float32)

    # PyTorch-style nn.Linear init: uniform(-1/sqrt(in_features), 1/sqrt(in_features)).
    bound = 1.0 / jnp.sqrt(jnp.float32(S))
    ada_w = jax.random.uniform(kw, (2 * C, S), dtype=jnp.float32, minval=-bound, maxval=bound)
    ada_b = jax.random.uniform(kb, (2 * C,), dtype=jnp.float32, minval=-bound, maxval=bound)

    out = conv_block_forward(x, style, ada_w, ada_b)
    out = jax.block_until_ready(out)

    ref = conv_block_reference(x, style, ada_w, ada_b)
    assert out.shape == (B, C, H, W)
    max_err = jnp.max(jnp.abs(out - ref))
    assert jnp.allclose(out, ref, atol=1e-5, rtol=1e-5), f"max abs err = {max_err}"

    print("KERNEL_OK")
</pallas_src>

<mosaic_0001>
module attributes {stable_mosaic.version = 11 : i64} {
  func.func @_adain_relu_kernel(%arg0: i32, %arg1: memref<8x256xf32, #tpu.memory_space<vmem>>, %arg2: memref<8x1xf32, #tpu.memory_space<vmem>>, %arg3: memref<8x1xf32, #tpu.memory_space<vmem>>, %arg4: memref<8x256xf32, #tpu.memory_space<vmem>>) attributes {dimension_semantics = [#tpu.dimension_semantics<parallel>], iteration_bounds = array<i64: 2>, scalar_prefetch = 0 : i64, scratch_operands = 0 : i64, tpu.core_type = #tpu.core_type<tc>, window_params = [{transform_indices = @transform_0, window_bounds = array<i64: 8, 256>}, {transform_indices = @transform_1, window_bounds = array<i64: 8, 1>}, {transform_indices = @transform_2, window_bounds = array<i64: 8, 1>}, {transform_indices = @transform_3, window_bounds = array<i64: 8, 256>}]} {
    %c0 = arith.constant 0 : index
    %c0_0 = arith.constant 0 : index
    %0 = vector.load %arg1[%c0, %c0_0] : memref<8x256xf32, #tpu.memory_space<vmem>>, vector<8x256xf32>
    %c0_1 = arith.constant 0 : index
    %c0_2 = arith.constant 0 : index
    %1 = vector.load %arg2[%c0_1, %c0_2] : memref<8x1xf32, #tpu.memory_space<vmem>>, vector<8x1xf32>
    %c0_3 = arith.constant 0 : index
    %c0_4 = arith.constant 0 : index
    %2 = vector.load %arg3[%c0_3, %c0_4] : memref<8x1xf32, #tpu.memory_space<vmem>>, vector<8x1xf32>
    %cst = arith.constant dense<0.000000e+00> : vector<8xf32>
    %3 = vector.multi_reduction <add>, %0, %cst [1] : vector<8x256xf32> to vector<8xf32>
    %4 = vector.shape_cast %3 : vector<8xf32> to vector<8x1xf32>
    %cst_5 = arith.constant 2.560000e+02 : f32
    %5 = vector.broadcast %cst_5 : f32 to vector<8x1xf32>
    %6 = arith.divf %4, %5 : vector<8x1xf32>
    %7 = vector.broadcast %6 : vector<8x1xf32> to vector<8x256xf32>
    %8 = arith.subf %0, %7 : vector<8x256xf32>
    %9 = arith.mulf %8, %8 : vector<8x256xf32>
    %cst_6 = arith.constant dense<0.000000e+00> : vector<8xf32>
    %10 = vector.multi_reduction <add>, %9, %cst_6 [1] : vector<8x256xf32> to vector<8xf32>
    %11 = vector.shape_cast %10 : vector<8xf32> to vector<8x1xf32>
    %cst_7 = arith.constant 2.560000e+02 : f32
    %12 = vector.broadcast %cst_7 : f32 to vector<8x1xf32>
    %13 = arith.divf %11, %12 : vector<8x1xf32>
    %14 = vector.broadcast %6 : vector<8x1xf32> to vector<8x256xf32>
    %15 = arith.subf %0, %14 : vector<8x256xf32>
    %cst_8 = arith.constant 9.99999974E-6 : f32
    %16 = vector.broadcast %cst_8 : f32 to vector<8x1xf32>
    %17 = arith.addf %13, %16 : vector<8x1xf32>
    %18 = math.rsqrt %17 : vector<8x1xf32>
    %19 = vector.broadcast %18 : vector<8x1xf32> to vector<8x256xf32>
    %20 = arith.mulf %15, %19 : vector<8x256xf32>
    %21 = vector.broadcast %1 : vector<8x1xf32> to vector<8x256xf32>
    %22 = arith.mulf %21, %20 : vector<8x256xf32>
    %23 = vector.broadcast %2 : vector<8x1xf32> to vector<8x256xf32>
    %24 = arith.addf %22, %23 : vector<8x256xf32>
    %cst_9 = arith.constant 0.000000e+00 : f32
    %25 = vector.broadcast %cst_9 : f32 to vector<8x256xf32>
    %26 = arith.maximumf %24, %25 : vector<8x256xf32>
    %c0_10 = arith.constant 0 : index
    %c0_11 = arith.constant 0 : index
    %27 = vector.load %arg4[%c0_10, %c0_11] : memref<8x256xf32, #tpu.memory_space<vmem>>, vector<8x256xf32>
    tpu.vector_store %arg4[%c0_10, %c0_11], %26 {strides = array<i32>} : memref<8x256xf32, #tpu.memory_space<vmem>>, vector<8x256xf32>,
    return
  }
  func.func @transform_0(%arg0: i32) -> (i32, i32) {
    %c0_i32 = arith.constant 0 : i32
    %c0_i32_0 = arith.constant 0 : i32
    return %arg0, %c0_i32 : i32, i32
  }
  func.func @transform_1(%arg0: i32) -> (i32, i32) {
    %c0_i32 = arith.constant 0 : i32
    %c0_i32_0 = arith.constant 0 : i32
    return %arg0, %c0_i32 : i32, i32
  }
  func.func @transform_2(%arg0: i32) -> (i32, i32) {
    %c0_i32 = arith.constant 0 : i32
    %c0_i32_0 = arith.constant 0 : i32
    return %arg0, %c0_i32 : i32, i32
  }
  func.func @transform_3(%arg0: i32) -> (i32, i32) {
    %c0_i32 = arith.constant 0 : i32
    %c0_i32_0 = arith.constant 0 : i32
    return %arg0, %c0_i32 : i32, i32
  }
}

</mosaic_0001>

<bundles_post_ra>
// kernel: tpu_custom_call.1
= control target key start
LH: loop header
LB: loop body
LE: loop exit
PB: predicated region body
PF: predicated region fallthrough
CT: control target
= control target key end

     0   :  { %8 = vsyncpa [#allocation3], 0  ;;  %s592_s0 = inlined_call_operand.vmem [shape: f32[16,256], index: 0, kind: input, shape index: {}]   ;;  %s593_s1 = inlined_call_operand.vmem [shape: f32[16,1], index: 1, kind: input, shape index: {}]   ;;  %s594_s2 = inlined_call_operand.vmem [shape: f32[16,1], index: 2, kind: input, shape index: {}]   ;;  %s595_s3 = inlined_call_operand.hbm [shape: f32[16,256], index: 3, kind: output, shape index: {}]  }
   0x1   :  { %10 = vsyncpa [#allocation3 + $0x1], 0  ;;  %s486_s12 = smov 0   ;;  %s488_s13 = smov 0  }
   0x2   :  { %s490_s14 = smov 0   ;;  %s492_s15 = smov 0  }
   0x3 LB: > { %s507_s16 = sadd.s32 4294967295, %s462_s15   ;;  %s340_s17 = sadd.s32 4294967294, %s462_s15   ;;  %s462_s15 = sphi %s492_s15, %s601_s15   ;;  %s458_s14 = sphi %s490_s14, %s600_s14   ;;  %s454_s13 = sphi %s488_s13, %s599_s13   ;;  %s450_s12 = sphi %s486_s12, %s598_s12  }
   0x4   : > { %s511_s18 = sadd.s32 1, %s462_s15   ;;  %s101_s19 = sadd.s32 1, %s458_s14 }
   0x5   : > { %s98_s20 = ssub.s32 %s462_s15, %s511_s18  ;;  %p111_p0 = scmp.ne.s32.totalorder %s458_s14, %s454_s13 }
   0x6   : > { %p99_p1 = scmp.eq.s32.totalorder %s98_s20, 0  ;;  %p112_p2 = scmp.eq.s32.totalorder %s507_s16, 1 }
   0x7   : > { %p117_p3 = scmp.ne.s32.totalorder %s454_s13, %s450_s12  ;;  %p118_p4 = scmp.eq.s32.totalorder %s340_s17, 1 }
   0x8   : > { %s522_s21 = scalar_select %p99_p1, %s458_s14, %s101_s19  }
   0x9   : > { %p524_p5 = por %p112_p2, %p111_p0  ;;  %p528_p6 = por %p118_p4, %p117_p3 }
   0xa   : > { %p343_p7 = scmp.ge.s32.totalorder %s462_s15, 1  ;;  %p158_p8 = scmp.lt.s32.totalorder %s462_s15, 3 }
   0xc   : > { %p159_p9 = pnand %p343_p7, %p158_p8 }
   0xd   : > { %p190_p10 = scmp.lt.s32.totalorder (!%p159_p9), %s507_s16, 1  ;;  %v464_v3 = vmov (!%p159_p9), 0   ;;  %s187_s9 = sand.u32 (!%p159_p9), 1, %s454_s13  }
   0xe   : > { %162 = sbr.rel (%p159_p9) target bundleno = 357 (0x165), region = 32  ;;  %396 = vset.pattern.permute.xlu1 (!%p159_p9), %v464_v3  ;;  %397 = vset.pattern.permute.xlu0 (!%p159_p9), %v464_v3  ;;  %s344_s10 = sshll.u32 (!%p159_p9), %s187_s9, 4 }
   0xf   : > { %s355_s11 = sshll.u32 (!%p159_p9), %s507_s16, 8  ;;  %s189_s17 = scalar_lea.vmem (!%p159_p9), [#allocation2], %s344_s10 }
  0x10   : > { %s257_s19 = sshll.u32 (!%p159_p9), %s189_s17, 4  ;;  %s243_s26 = scalar_lea.sflag (!%p159_p9), [#allocation3], %s187_s9  ;;  %s552_s19 = int_to_ptr.vmem [resolvable:$true] %s257_s19 }
  0x11   : > { %s465_s27 = smov (!%p159_p9), [#allocation2]  }
  0x15   : > { %s191_s24 = scalar_select %p190_p10, %s507_s16, 1 }
  0x16   : > { %s400_s16 = scalar_lea.vmem %s552_s19, 256 }
  0x17   : > { %s354_s25 = sshll.u32 %s191_s24, 4  ;;  %s347_s29 = sshll.u32 %s191_s24, 3 }
  0x18   : > { %s194_s28 = scalar_lea.vmem %s592_s0, %s354_s25  ;;  %s198_s5 = scalar_lea.vmem %s593_s1, %s347_s29 }
  0x19   : > { %v203_v0 = vld [vmem:[%s194_s28] sm:$0xff]  ;;  %v204_v1 = vld [vmem:[%s194_s28 + $0x8] sm:$0xff]  ;;  %s202_s8 = scalar_lea.vmem %s594_s2, %s347_s29  ;;  %s550_s25 = scalar_lea.hbm %s595_s3, %s355_s11 }
  0x1a   : > { %v207_v2 = vadd.f32 %v204_v1, %v203_v0  ;;  %v205_v4 = vld [vmem:[%s198_s5] sm:$0xff]  ;;  %p401_p11 = scmp.ne.s32.totalorder %s552_s19, %s400_s16  ;;  %s404_s28 = sshll.u32 %s465_s27, 4  ;;  %s405_s28 = int_to_ptr.vmem [resolvable:$false] %s404_s28 }
  0x1b   : > { %226 = vperm.xlu1 %396, %v205_v4   ;;  %v206_v5 = vld [vmem:[%s202_s8] sm:$0xff]  ;;  %s406_s29 = scalar_lea.vmem %s405_s28, 512  ;;  %p407_p0 = scmp.lt.s32.totalorder %s552_s19, %s405_s28 }
  0x1c   : > { %208 = vadd.xlane.f32.xlu0 %v207_v2  ;;  %p402_p12 = pnand %p401_p11, %p524_p5  ;;  %p408_p1 = scmp.lt.s32.totalorder %s406_s29, %s400_s16 }
  0x1e   : > { %p403_p13 = pneg %p402_p12  ;;  %p409_p2 = por %p408_p1, %p407_p0 }
  0x1f   : > { %233 = vperm.xlu1 %396, %v206_v5  }
  0x20   : > { %p410_p3 = pnand %p409_p2, %p403_p13 }
  0x9a   : > { %v227_v16 = vpop.permute.xlu1 %226 }
  0x9e   : > { %v234_v22 = vpop.permute.xlu1 %233 }
  0xa9   : > { %v209_v6 = vpop.xlane.xlu0 %208 }
  0xaa   : > { %v211_v7 = vmul.f32 0.00390625, %v209_v6 }
  0xac   : > { %v212_v8 = vsub.f32 %v203_v0, %v211_v7  ;;  %v213_v9 = vsub.f32 %v204_v1, %v211_v7 }
  0xae   : > { %v214_v10 = vmul.f32 %v212_v8, %v212_v8  ;;  %v215_v11 = vmul.f32 %v213_v9, %v213_v9 }
  0xb0   : > { %v216_v12 = vadd.f32 %v215_v11, %v214_v10 }
  0xb2   : > { %217 = vadd.xlane.f32.xlu0 %v216_v12 }
 0x13f   : > { %v218_v13 = vpop.xlane.xlu0 %217 }
 0x140   : > { %v219_v14 = vmul.f32 0.00390625, %v218_v13 }
 0x142   : > { %v220_v15 = vadd.f32 1e-05, %v219_v14 }
 0x144   : > { %398 = vrsqrt.f32 %v220_v15 }
 0x14e   : > { %v399_v17 = vpop.eup %398 }
 0x14f   : > { %v222_v18 = vmul.f32 %v399_v17, %v212_v8  ;;  %v223_v19 = vmul.f32 %v399_v17, %v213_v9 }
 0x151   : > { %v229_v20 = vmul.f32 %v227_v16, %v222_v18  ;;  %v230_v21 = vmul.f32 %v227_v16, %v223_v19 }
 0x153   : > { %v236_v23 = vadd.f32 %v234_v22, %v229_v20  ;;  %v237_v24 = vadd.f32 %v234_v22, %v230_v21 }
 0x155   : > { %v238_v25 = vmax.f32 %v236_v23, 0.0  ;;  %v239_v26 = vmax.f32 %v237_v24, 0.0 }
 0x157   : > { %240 = vst [vmem:[%s189_s17] sm:$0xff] %v238_v25  ;;  %241 = vst [vmem:[%s189_s17 + $0x8] sm:$0xff] %v239_v26 }
 0x158   : > { %413 = shalt.err (!%p410_p3)
}
 0x159   : > { %s414_s30 = scalar_lea.hbm %s550_s25, 256  ;;  %s418_s6 = scalar_lea.hbm %s595_s3, 512 }
 0x15a   : > { %p415_p4 = scmp.ne.s32.totalorder %s550_s25, %s414_s30  ;;  %p419_p9 = scmp.lt.u32.totalorder %s550_s25, %s595_s3 }
 0x15b   : > { %p420_p10 = scmp.lt.u32.totalorder %s418_s6, %s414_s30  ;;  %p422_p12 = scmp.lt.u32.totalorder %s414_s30, %s550_s25 }
 0x15c   : > { %p416_p7 = pnand %p415_p4, %p524_p5 }
 0x15d   : > { %p421_p11 = por %p420_p10, %p419_p9 }
 0x15e   : > { %p417_p8 = pneg %p416_p7 }
 0x15f   : > { %p423_p13 = por %p422_p12, %p421_p11 }
 0x161   : > { %p424_p0 = pnand %p423_p13, %p417_p8 }
 0x163   : > { %427 = shalt.err (!%p424_p0)
}
 0x164   : > { %356 = dma.vmem_to_hbm [thread:$0]  (%p524_p5), %s552_s19, 256, %s550_s25, %s243_s26  }
 0x165 PF: > { %p362_p1 = scmp.ge.s32.totalorder %s462_s15, 2  ;;  %s269_s9 = sand.u32 1, %s450_s12  }
 0x166   : > { %s270_s10 = scalar_lea.sflag [#allocation3], %s269_s9 }
 0x167   : > { %p359_p2 = pnand %p362_p1, %p528_p6 }
 0x169   : > { %445 = dma.done.wait (!%p359_p2), %s270_s10, 256  }
 0x16a   : > { %447 = vsyncadd (!%p359_p2), %s270_s10, 4294967040  ;;  %p13_p3 = scmp.ge.s32.totalorder %s511_s18, 4   ;;  %s598_s12 = smov %s454_s13 }
 0x16b   : > { %s599_s13 = smov %s458_s14  ;;  %s600_s14 = smov %s522_s21 }
 0x16c   : > { %s601_s15 = smov %s511_s18  ;;  %15 = sbr.rel (!%p13_p3) target bundleno = 3 (0x3), region = 73 }
 0x173   :  { %275 = vsyncpa [#allocation3], 1 }
 0x174   :  { %277 = vsyncpa [#allocation3 + $0x1], 1 }

</bundles_post_ra>
